<compile_context>
chip_gen: v5e
topology: v5e:2x2
jax: 0.10.0
libtpu: 0.0.40
codegen_flags: <defaults>
</compile_context>

<pallas_src>
import functools
import numpy as np
import jax
import jax.numpy as jnp
from jax.experimental import pallas as pl
from jax.experimental.pallas import tpu as pltpu  # noqa: F401  (kept for TPU-specific extensions)


def _bilinear_matrix(n_in, n_out):
    """Interpolation matrix matching F.upsample(mode='bilinear', align_corners=False)."""
    scale = n_in / n_out
    m = np.zeros((n_out, n_in), dtype=np.float32)
    for i in range(n_out):
        src = max((i + 0.5) * scale - 0.5, 0.0)
        i0 = min(int(np.floor(src)), n_in - 1)
        i1 = min(i0 + 1, n_in - 1)
        lam = src - i0
        m[i, i0] += 1.0 - lam
        m[i, i1] += lam
    return m


def _cam_kernel(p, x_ref, wb_ref, wfc_ref, bfc_ref, pool_ref, up_ref,
                cls_ref, heat_ref):
    # x_ref: (Cin_pad, B*P) bf16 — pixels on lanes, batch folded onto lanes
    # (batch 0 occupies lane-columns [0, P)), bias/ones row appended.
    # Backbone 1x1 conv (+bias via the ones row) as one bf16 MXU matmul, ReLU in f32.
    featT = jnp.maximum(
        jnp.dot(wb_ref[...], x_ref[...], preferred_element_type=jnp.float32),
        0.0)                                                              # (Cf, B*P) f32
    # Shared fc / 1x1-conv head logits; bias added once in f32 (mean-pooling commutes
    # with a per-row constant because the pool columns sum to exactly 1).
    logitsT = jnp.dot(wfc_ref[...], featT.astype(jnp.bfloat16),
                      preferred_element_type=jnp.float32) + bfc_ref[...]  # (K, B*P) f32
    # Classification scores for ALL batches in one block-diagonal mean-pool matmul.
    cls = jax.nn.sigmoid(
        jnp.dot(logitsT.astype(jnp.bfloat16), pool_ref[...],
                preferred_element_type=jnp.float32))                      # (K, B) f32
    cls_ref[...] = cls
    # Heat map (only batch 0 is ever consumed): per-class maps for batch 0, weighted by
    # its class scores, summed over K (8-wide sublane reduce, no relayout), then the
    # fused separable bilinear upsample as a single matmul -> lane-dense (1, H*W) row.
    cmap0 = jax.nn.sigmoid(logitsT[:, :p])                                # (K, P) f32
    weighted = jnp.sum(cls[:, 0:1] * cmap0, axis=0, keepdims=True)        # (1, P) f32
    heat_ref[...] = jnp.dot(weighted.astype(jnp.bfloat16), up_ref[...],
                            preferred_element_type=jnp.float32)           # (1, H*W) f32


def cam_forward(x_nchw, wb, bb, wfc, bfc):
    """x_nchw: (B, C_in, H, W); wb: (C_feat, C_in) backbone 1x1-conv weight (out, in);
    wfc: (K, C_feat) fc weight (PyTorch (out, in) convention); bb/bfc biases."""
    B, Cin, H, W = x_nchw.shape
    Cf = wb.shape[0]
    K = wfc.shape[0]

    # TODO(synk): the original backbone (model_to_convert.features) is arbitrary user code;
    # here it is a synthetic stride-2 1x1 conv + ReLU (striding stays in XLA glue since
    # lane-strided in-kernel loads are not reliably supported; the conv runs in-kernel).
    xs = x_nchw[:, :, ::2, ::2]                           # (B, Cin, Hf, Wf)
    Hf, Wf = xs.shape[2], xs.shape[3]
    P = Hf * Wf
    BP = B * P

    # Pixels-on-lanes with batch folded onto lanes: column index j = b*P + p.
    xT = xs.reshape(B, Cin, P).transpose(1, 0, 2).reshape(Cin, BP)
    # Fold the backbone bias into the matmul via an appended ones row, and zero-pad the
    # contraction dim to a multiple of 8 (free; keeps the MXU feed aligned).
    cin_pad = -(-(Cin + 1) // 8) * 8
    x_aug = jnp.concatenate(
        [xT, jnp.ones((1, BP), xT.dtype),
         jnp.zeros((cin_pad - Cin - 1, BP), xT.dtype)], axis=0
    ).astype(jnp.bfloat16)                                # (cin_pad, BP) bf16
    wb_aug = jnp.concatenate(
        [wb, bb.reshape(Cf, 1),
         jnp.zeros((Cf, cin_pad - Cin - 1), wb.dtype)], axis=1
    ).astype(jnp.bfloat16)                                # (Cf, cin_pad) bf16

    # Per-batch mean-pool operator: block-diagonal (BP, B) with 1/P entries
    # (1/P = 1/64 is an exact power of two, so exact in bf16; columns sum to 1).
    pool = jnp.asarray(
        np.kron(np.eye(B, dtype=np.float32),
                np.full((P, 1), 1.0 / P, np.float32)),
        dtype=jnp.bfloat16)                               # (BP, B) bf16

    # Fused separable bilinear-upsample operator: flat (Hf*Wf) -> flat (H*W), bf16
    # (largest DMA'd operand; accumulation of the final matmul stays f32).
    wh = _bilinear_matrix(Hf, H)                          # (H, Hf)
    ww = _bilinear_matrix(Wf, W)                          # (W, Wf)
    up_t = jnp.asarray(np.kron(wh, ww).T, dtype=jnp.bfloat16)   # (P, H*W) bf16

    cls_kb, heat = pl.pallas_call(
        functools.partial(_cam_kernel, P),
        out_shape=(jax.ShapeDtypeStruct((K, B), jnp.float32),
                   jax.ShapeDtypeStruct((1, H * W), jnp.float32)),
    )(x_aug,
      wb_aug,
      wfc.astype(jnp.bfloat16),
      bfc.reshape(K, 1).astype(jnp.float32),
      pool,
      up_t)

    cls_score = cls_kb.T                  # (B, K); tiny transpose done in XLA glue
    heat_map = heat.reshape(H, W)         # PyTorch returns the heat map for batch element 0
    return cls_score, heat_map


def _reference(x_nchw, wb, bb, wfc, bfc):
    """Pure-JAX reference in the original PyTorch op order (upsample before weighting)."""
    B, Cin, H, W = x_nchw.shape
    xs = x_nchw[:, :, ::2, ::2]
    Hf, Wf = xs.shape[2], xs.shape[3]
    feat = jax.nn.relu(jnp.einsum('bchw,fc->bfhw', xs, wb) + bb[None, :, None, None])
    cmap = jax.nn.sigmoid(jnp.einsum('bfhw,kf->bkhw', feat, wfc) + bfc[None, :, None, None])
    wh = jnp.asarray(_bilinear_matrix(Hf, H))
    ww = jnp.asarray(_bilinear_matrix(Wf, W))
    cmap_up = jnp.einsum('Oh,bkhw,Pw->bkOP', wh, cmap, ww)
    pooled = jnp.mean(feat, axis=(2, 3))
    cls = jax.nn.sigmoid(pooled @ wfc.T + bfc)
    weighted = jnp.sum(cmap_up * cls[:, :, None, None], axis=1)
    return cls, weighted[0]


if __name__ == "__main__":
    key = jax.random.PRNGKey(0)
    k1, k2, k3, k4, k5 = jax.random.split(key, 5)
    B, C_in, H, W = 2, 4, 16, 16
    C_feat, K = 32, 8

    x = jax.random.normal(k1, (B, C_in, H, W), jnp.float32)
    wb = jax.random.normal(k2, (C_feat, C_in), jnp.float32) * 0.2    # backbone 1x1 conv weight
    bb = jax.random.normal(k3, (C_feat,), jnp.float32) * 0.1
    wfc = jax.random.normal(k4, (K, C_feat), jnp.float32) * 0.2      # fc weight (out, in)
    bfc = jax.random.normal(k5, (K,), jnp.float32) * 0.1

    cls_score, heat_map = cam_forward(x, wb, bb, wfc, bfc)
    jax.block_until_ready((cls_score, heat_map))

    cls_ref, heat_ref = _reference(x, wb, bb, wfc, bfc)
    np.testing.assert_allclose(np.asarray(cls_score), np.asarray(cls_ref), rtol=1e-2, atol=1e-2)
    np.testing.assert_allclose(np.asarray(heat_map), np.asarray(heat_ref), rtol=1e-2, atol=2e-2)

    assert cls_score.shape == (B, K)
    assert heat_map.shape == (H, W)
    print("KERNEL_OK")
</pallas_src>

<mosaic_0001>
module attributes {stable_mosaic.version = 11 : i64} {
  func.func @_cam_kernel(%arg0: memref<8x128xbf16, #tpu.memory_space<vmem>>, %arg1: memref<32x8xbf16, #tpu.memory_space<vmem>>, %arg2: memref<8x32xbf16, #tpu.memory_space<vmem>>, %arg3: memref<8x1xf32, #tpu.memory_space<vmem>>, %arg4: memref<128x2xbf16, #tpu.memory_space<vmem>>, %arg5: memref<64x256xbf16, #tpu.memory_space<vmem>>, %arg6: memref<8x2xf32, #tpu.memory_space<vmem>>, %arg7: memref<1x256xf32, #tpu.memory_space<vmem>>) attributes {dimension_semantics = [], scalar_prefetch = 0 : i64, scratch_operands = 0 : i64, tpu.core_type = #tpu.core_type<tc>} {
    %c0 = arith.constant 0 : index
    %c0_0 = arith.constant 0 : index
    %0 = vector.load %arg1[%c0, %c0_0] : memref<32x8xbf16, #tpu.memory_space<vmem>>, vector<32x8xbf16>
    %c0_1 = arith.constant 0 : index
    %c0_2 = arith.constant 0 : index
    %1 = vector.load %arg0[%c0_1, %c0_2] : memref<8x128xbf16, #tpu.memory_space<vmem>>, vector<8x128xbf16>
    %cst = arith.constant dense<0.000000e+00> : vector<32x128xf32>
    %2 = tpu.matmul %0, %1, %cst {dimension_numbers = #tpu.dot_dimension_numbers<[1], [0], [0], [1], [0, 0, 1, 1], [], []>} : vector<32x8xbf16>, vector<8x128xbf16>, vector<32x128xf32> -> vector<32x128xf32>
    %cst_3 = arith.constant 0.000000e+00 : f32
    %3 = vector.broadcast %cst_3 : f32 to vector<32x128xf32>
    %4 = arith.maximumf %2, %3 : vector<32x128xf32>
    %c0_4 = arith.constant 0 : index
    %c0_5 = arith.constant 0 : index
    %5 = vector.load %arg2[%c0_4, %c0_5] : memref<8x32xbf16, #tpu.memory_space<vmem>>, vector<8x32xbf16>
    %6 = arith.truncf %4 : vector<32x128xf32> to vector<32x128xbf16>
    %cst_6 = arith.constant dense<0.000000e+00> : vector<8x128xf32>
    %7 = tpu.matmul %5, %6, %cst_6 {dimension_numbers = #tpu.dot_dimension_numbers<[1], [0], [0], [1], [0, 0, 1, 1], [], []>} : vector<8x32xbf16>, vector<32x128xbf16>, vector<8x128xf32> -> vector<8x128xf32>
    %c0_7 = arith.constant 0 : index
    %c0_8 = arith.constant 0 : index
    %8 = vector.load %arg3[%c0_7, %c0_8] : memref<8x1xf32, #tpu.memory_space<vmem>>, vector<8x1xf32>
    %9 = vector.broadcast %8 : vector<8x1xf32> to vector<8x128xf32>
    %10 = arith.addf %7, %9 : vector<8x128xf32>
    %11 = arith.truncf %10 : vector<8x128xf32> to vector<8x128xbf16>
    %c0_9 = arith.constant 0 : index
    %c0_10 = arith.constant 0 : index
    %12 = vector.load %arg4[%c0_9, %c0_10] : memref<128x2xbf16, #tpu.memory_space<vmem>>, vector<128x2xbf16>
    %cst_11 = arith.constant dense<0.000000e+00> : vector<8x2xf32>
    %13 = tpu.matmul %11, %12, %cst_11 {dimension_numbers = #tpu.dot_dimension_numbers<[1], [0], [0], [1], [0, 0, 1, 1], [], []>} : vector<8x128xbf16>, vector<128x2xbf16>, vector<8x2xf32> -> vector<8x2xf32>
    %14 = arith.negf %13 : vector<8x2xf32>
    %15 = math.exp %14 : vector<8x2xf32>
    %cst_12 = arith.constant 1.000000e+00 : f32
    %16 = vector.broadcast %cst_12 : f32 to vector<8x2xf32>
    %17 = arith.addf %16, %15 : vector<8x2xf32>
    %18 = arith.divf %16, %17 : vector<8x2xf32>
    %c0_13 = arith.constant 0 : index
    %c0_14 = arith.constant 0 : index
    %19 = vector.load %arg6[%c0_13, %c0_14] : memref<8x2xf32, #tpu.memory_space<vmem>>, vector<8x2xf32>
    tpu.vector_store %arg6[%c0_13, %c0_14], %18 {strides = array<i32>} : memref<8x2xf32, #tpu.memory_space<vmem>>, vector<8x2xf32>,
    %20 = vector.extract_strided_slice %10 {offsets = [0, 0], sizes = [8, 64], strides = [1, 1]} : vector<8x128xf32> to vector<8x64xf32>
    %21 = arith.negf %20 : vector<8x64xf32>
    %22 = math.exp %21 : vector<8x64xf32>
    %cst_15 = arith.constant 1.000000e+00 : f32
    %23 = vector.broadcast %cst_15 : f32 to vector<8x64xf32>
    %24 = arith.addf %23, %22 : vector<8x64xf32>
    %25 = arith.divf %23, %24 : vector<8x64xf32>
    %26 = vector.extract_strided_slice %18 {offsets = [0, 0], sizes = [8, 1], strides = [1, 1]} : vector<8x2xf32> to vector<8x1xf32>
    %27 = vector.broadcast %26 : vector<8x1xf32> to vector<8x64xf32>
    %28 = arith.mulf %27, %25 : vector<8x64xf32>
    %cst_16 = arith.constant dense<0.000000e+00> : vector<64xf32>
    %29 = vector.multi_reduction <add>, %28, %cst_16 [0] : vector<8x64xf32> to vector<64xf32>
    %30 = vector.shape_cast %29 : vector<64xf32> to vector<1x64xf32>
    %31 = arith.truncf %30 : vector<1x64xf32> to vector<1x64xbf16>
    %c0_17 = arith.constant 0 : index
    %c0_18 = arith.constant 0 : index
    %32 = vector.load %arg5[%c0_17, %c0_18] : memref<64x256xbf16, #tpu.memory_space<vmem>>, vector<64x256xbf16>
    %cst_19 = arith.constant dense<0.000000e+00> : vector<1x256xf32>
    %33 = tpu.matmul %31, %32, %cst_19 {dimension_numbers = #tpu.dot_dimension_numbers<[1], [0], [0], [1], [0, 0, 1, 1], [], []>} : vector<1x64xbf16>, vector<64x256xbf16>, vector<1x256xf32> -> vector<1x256xf32>
    %c0_20 = arith.constant 0 : index
    %c0_21 = arith.constant 0 : index
    %34 = vector.load %arg7[%c0_20, %c0_21] : memref<1x256xf32, #tpu.memory_space<vmem>>, vector<1x256xf32>
    tpu.vector_store %arg7[%c0_20, %c0_21], %33 {strides = array<i32>} : memref<1x256xf32, #tpu.memory_space<vmem>>, vector<1x256xf32>,
    return
  }
}

</mosaic_0001>

<bundles_post_ra>
// kernel: tpu_custom_call.1
= control target key start
LH: loop header
LB: loop body
LE: loop exit
PB: predicated region body
PF: predicated region fallthrough
CT: control target
= control target key end

     0   :  { %vm49_vm0 = vcmask 1043456   ;;  %s612_s0 = inlined_call_operand.vmem [shape: bf16[8,128], index: 0, kind: input, shape index: {}]   ;;  %s613_s1 = inlined_call_operand.vmem [shape: bf16[32,8], index: 1, kind: input, shape index: {}]   ;;  %s614_s2 = inlined_call_operand.vmem [shape: bf16[8,32], index: 2, kind: input, shape index: {}]   ;;  %s615_s3 = inlined_call_operand.vmem [shape: f32[8,1], index: 3, kind: input, shape index: {}]   ;;  %s616_s4 = inlined_call_operand.vmem [shape: bf16[128,2], index: 4, kind: input, shape index: {}]   ;;  %s617_s5 = inlined_call_operand.vmem [shape: bf16[64,256], index: 5, kind: input, shape index: {}]   ;;  %s618_s6 = inlined_call_operand.vmem [shape: f32[8,2], index: 6, kind: output, shape index: {0}]   ;;  %s619_s7 = inlined_call_operand.hbm [shape: f32[1,256], index: 7, kind: output, shape index: {1}]  }
   0x1   :  { %v31_v0 = vld [vmem:[%s612_s0] sm:$0xf] }
   0x2   :  { %v51_v1 = vsel %vm49_vm0, %v31_v0, 0  ;;  %v422_v2 = vld [vmem:[%s613_s1] sm:$0xff] }
   0x3   :  { %13 = vsyncpa [#allocation3], 0  ;;  %60 = vmatpush.bf16.msra.mxu0 %v51_v1  ;;  %vm42_vm1 = vcmask 64512   ;;  %v423_v3 = vld [vmem:[%s613_s1 + $0x8] sm:$0xff]  ;;  %v79_v5 = vld [vmem:[%s615_s3] sm:$0xff]  ;;  %v477_v7 = vmov 0  }
   0x4   :  { %v431_v6 = vld [vmem:[%s616_s4 + $0x38] sm:$0xff]  ;;  %442 = vset.pattern.permute.xlu0 %v477_v7  ;;  %v430_v8 = vld [vmem:[%s616_s4 + $0x30] sm:$0xff]  ;;  %v429_v10 = vld [vmem:[%s616_s4 + $0x28] sm:$0xff]  ;;  %vm85_vm2 = vcmask 261120   ;;  %vm199_vm6 = vcmask 15360   ;;  %vm226_vm12 = vcmask 523264  }
   0x5   :  { %82 = vperm.xlu0 %442, %v79_v5   ;;  %167 = vmatpush.bf16.msra.mxu2 %v431_v6  ;;  %v428_v11 = vld [vmem:[%s616_s4 + $0x20] sm:$0xff]  ;;  %v427_v13 = vld [vmem:[%s616_s4 + $0x18] sm:$0xff]  ;;  %v426_v14 = vld [vmem:[%s616_s4 + $0x10] sm:$0xff]  ;;  %s332_s30 = sshll.u32 %s619_s7, 4  ;;  %vm315_vm13 = vcmask 1040384   ;;  %s333_s30 = int_to_ptr.hbm [resolvable:$true] %s332_s30 }
   0x6   :  { %351 = vmatmul.msk.bf16.vlgmr.msra.gmra.mxu0 %vm42_vm1, %v422_v2  ;;  %v425_v18 = vld [vmem:[%s616_s4 + $0x8] sm:$0xff]  ;;  %v76_v23 = vld [vmem:[%s614_s2] sm:$0xf]  ;;  %v414_v48 = vld [vmem:[%s617_s5 + $0x30] sm:$0xf] }
   0x7   :  { %v424_v24 = vld [vmem:[%s616_s4] sm:$0xff]  ;;  %v439_v49 = vld [vmem:[%s617_s5 + $0x34] sm:$0xf0]  ;;  %v438_v50 = vld [vmem:[%s617_s5 + $0x34] sm:$0xf] }
   0x8   :  { %v415_v51 = vor.u32 %v439_v49, %v414_v48  ;;  %v416_v52 = vld [vmem:[%s617_s5 + $0x38] sm:$0xf0]  ;;  %v406_v53 = vld [vmem:[%s617_s5 + $0x20] sm:$0xf]  ;;  %v437_v54 = vld [vmem:[%s617_s5 + $0x24] sm:$0xf0] }
   0x9   :  { %168 = vmatpush.bf16.msra.mxu2 %v430_v8  ;;  %v419_v55 = vor.u32 %v438_v50, %v416_v52  ;;  %v436_v56 = vld [vmem:[%s617_s5 + $0x24] sm:$0xf]  ;;  %v408_v57 = vld [vmem:[%s617_s5 + $0x28] sm:$0xf0]  ;;  %v407_v58 = vor.u32 %v437_v54, %v406_v53  ;;  %v398_v60 = vld [vmem:[%s617_s5 + $0x10] sm:$0xf] }
   0xa   :  { %290 = vmatpush.bf16.msra.mxu3 %v415_v51  ;;  %v411_v59 = vor.u32 %v436_v56, %v408_v57  ;;  %v435_v61 = vld [vmem:[%s617_s5 + $0x14] sm:$0xf0]  ;;  %v434_v62 = vld [vmem:[%s617_s5 + $0x14] sm:$0xf]  ;;  %v400_v63 = vld [vmem:[%s617_s5 + $0x18] sm:$0xf0] }
   0xb   :  { %v399_v0 = vor.u32 %v435_v61, %v398_v60  ;;  %v403_v1 = vor.u32 %v434_v62, %v400_v63  ;;  %v390_v2 = vld [vmem:[%s617_s5] sm:$0xf]  ;;  %v392_v5 = vld [vmem:[%s617_s5 + $0x8] sm:$0xf0] }
   0xd   :  { %169 = vmatpush.bf16.msra.mxu2 %v429_v10 }
   0xe   :  { %291 = vmatpush.bf16.msra.mxu3 %v407_v58 }
  0x11   :  { %170 = vmatpush.bf16.msra.mxu2 %v428_v11 }
  0x12   :  { %292 = vmatpush.bf16.msra.mxu3 %v399_v0 }
  0x15   :  { %171 = vmatpush.bf16.msra.mxu2 %v427_v13 }
  0x16   :  { %352 = vmatmul.msk.bf16.gmra.mxu0 %vm42_vm1, %v423_v3  ;;  %v433_v3 = vld [vmem:[%s617_s5 + $0x4] sm:$0xf0] }
  0x17   :  { %v391_v7 = vor.u32 %v433_v3, %v390_v2 }
  0x19   :  { %172 = vmatpush.bf16.msra.mxu2 %v426_v14  ;;  %293 = vmatpush.bf16.msra.mxu3 %v391_v7 }
  0x1d   :  { %173 = vmatpush.bf16.msra.mxu2 %v425_v18 }
  0x21   :  { %174 = vmatpush.bf16.msra.mxu2 %v424_v24 }
  0x77   :  { %v83_v25 = vpop.permute.xlu0 %82 }
  0x83   :  { %v62_v4 = vpop.f32.mrf.mxu0 }
  0x84   :  { %v72_v21 = vmax.f32 %v62_v4, 0.0  ;;  %v432_v4 = vld [vmem:[%s617_s5 + $0x4] sm:$0xf]  ;;  %s478_s5 = smov [#allocation2]  }
  0x85   :  { %v395_v8 = vor.u32 %v432_v4, %v392_v5  ;;  %s330_s27 = sshll.u32 %s478_s5, 4  ;;  %s331_s27 = int_to_ptr.vmem [resolvable:$true] %s330_s27 }
  0x8b   :  { %v64_v9 = vpop.f32.mrf.mxu0 }
  0x8c   :  { %v73_v19 = vmax.f32 %v64_v9, 0.0 }
  0x8e   :  { %v77_v22 = vpack.c.bf16 %v73_v19, %v72_v21 }
  0x93   :  { %v67_v12 = vpop.f32.mrf.mxu0 }
  0x94   :  { %v74_v16 = vmax.f32 %v67_v12, 0.0 }
  0x9b   :  { %v69_v15 = vpop.f32.mrf.mxu0 }
  0x9c   :  { %v75_v17 = vmax.f32 %v69_v15, 0.0 }
  0x9e   :  { %v78_v20 = vpack.c.bf16 %v75_v17, %v74_v16 }
  0xa0   :  { %95 = vmatpush.bf16.msra.mxu1 %v78_v20 }
  0xa4   :  { %96 = vmatpush.bf16.msra.mxu1 %v77_v22 }
  0xa7   :  { %353 = vmatmul.msk.bf16.vlgmr.msra.gmra.mxu1 %vm85_vm2, %v76_v23 }
  0xa8   :  { %303 = vmatpush.bf16.msrb.mxu1 %v419_v55 }
  0xac   :  { %304 = vmatpush.bf16.msrb.mxu1 %v411_v59 }
  0xb0   :  { %305 = vmatpush.bf16.msrb.mxu1 %v403_v1 }
  0xb4   :  { %306 = vmatpush.bf16.msrb.mxu1 %v395_v8 }
 0x124   :  { %v98_v26 = vpop.f32.mrf.mxu1 }
 0x125   :  { %v99_v27 = vadd.f32 %v98_v26, %v83_v25 }
 0x127   :  { %v102_v28 = vpack.c.bf16 %v99_v27, %v99_v27  ;;  %v387_v45 = vmul.f32 -1.442695, %v99_v27 }
 0x129   :  { %175 = vmatmul.bf16.vlgmr.msra.gmra.mxu2 %v102_v28 }
 0x12c   :  { %v100_v29 = vpop.f32.mrf.mxu1 }
 0x12d   :  { %v318_v29 = vlaneseq }
 0x12f   :  { %vm320_vm14 = vcmp.lt.s32.totalorder %v318_v29, 256 }
 0x1ac   :  { %v176_v30 = vpop.f32.mrf.mxu2 }
 0x1ad   :  { %v386_v31 = vmul.f32 -1.442695, %v176_v30 }
 0x1af   :  { %443 = vpow2.f32 %v386_v31 }
 0x1b4   :  { %v178_v32 = vpop.f32.mrf.mxu2 }
 0x1b5   :  { %v444_v33 = vpop.eup %443 }
 0x1b6   :  { %v183_v34 = vadd.f32 1.0, %v444_v33 }
 0x1b8   :  { %445 = vrcp.f32 %v183_v34  ;;  %v195_v38 = vand.u32 2147483648, %v183_v34  ;;  %v193_v40 = vand.u32 2147483647, %v183_v34  ;;  %vm189_vm4 = vweird.f32 %v183_v34 }
 0x1b9   :  { %447 = vpow2.f32 %v387_v45 }
 0x1ba   :  { %v196_v42 = vor.u32 1.1754944e-38, %v195_v38  ;;  %vm194_vm7 = vcmp.eq.f32.partialorder %v193_v40, 8.507059e+37 }
 0x1be   :  { %v446_v35 = vpop.eup %445 }
 0x1bf   :  { %v185_v36 = vmul.f32 %v446_v35, %v183_v34  ;;  %vm190_vm3 = vweird.f32 %v446_v35  ;;  %v448_v46 = vpop.eup %447 }
 0x1c0   :  { %vm191_vm5 = vmor %vm189_vm4, %vm190_vm3  ;;  %v204_v47 = vadd.f32 1.0, %v448_v46 }
 0x1c1   :  { %v186_v37 = vsub.f32 1.0, %v185_v36 }
 0x1c2   :  { %449 = vrcp.f32 %v204_v47  ;;  %v216_v13 = vand.u32 2147483648, %v204_v47  ;;  %vm210_vm9 = vweird.f32 %v204_v47  ;;  %v214_v14 = vand.u32 2147483647, %v204_v47 }
 0x1c3   :  { %v187_v39 = vmul.f32 %v446_v35, %v186_v37 }
 0x1c4   :  { %v217_v16 = vor.u32 1.1754944e-38, %v216_v13  ;;  %vm215_vm11 = vcmp.eq.f32.partialorder %v214_v14, 8.507059e+37 }
 0x1c5   :  { %v188_v41 = vadd.f32 %v446_v35, %v187_v39 }
 0x1c7   :  { %v192_v43 = vsel %vm191_vm5, %v446_v35, %v188_v41 }
 0x1c8   :  { %v197_v44 = vsel %vm194_vm7, %v196_v42, %v192_v43  ;;  %v450_v6 = vpop.eup %449 }
 0x1c9   :  { %222 = vperm.xlu0 %442, %v197_v44   ;;  %200 = vst.msk [vmem:[%s618_s6] sm:$0xff] %vm199_vm6, %v197_v44  ;;  %v206_v9 = vmul.f32 %v450_v6, %v204_v47  ;;  %vm211_vm8 = vweird.f32 %v450_v6 }
 0x1ca   :  { %vm212_vm10 = vmor %vm210_vm9, %vm211_vm8 }
 0x1cb   :  { %v207_v10 = vsub.f32 1.0, %v206_v9 }
 0x1cd   :  { %v208_v11 = vmul.f32 %v450_v6, %v207_v10 }
 0x1cf   :  { %v209_v12 = vadd.f32 %v450_v6, %v208_v11 }
 0x1d1   :  { %v213_v15 = vsel %vm212_vm10, %v450_v6, %v209_v12 }
 0x1d2   :  { %v218_v17 = vsel %vm215_vm11, %v217_v16, %v213_v15 }
 0x23b   :  { %v223_v18 = vpop.permute.xlu0 %222 }
 0x23c   :  { %v225_v19 = vmul.f32 %v223_v18, %v218_v17 }
 0x23e   :  { %v227_v20 = vsel %vm226_vm12, %v225_v19, 0.0 }
 0x23f   :  { %v228_v21 = vrot.slane %v227_v20, 4 }
 0x241   :  { %v229_v22 = vadd.f32 %v228_v21, %v227_v20 }
 0x243   :  { %v230_v23 = vrot.slane %v229_v22, 2 }
 0x245   :  { %v231_v24 = vadd.f32 %v230_v23, %v229_v22 }
 0x247   :  { %v232_v25 = vrot.slane %v231_v24, 1 }
 0x249   :  { %v233_v26 = vadd.f32 %v232_v25, %v231_v24 }
 0x24b   :  { %v234_v27 = vpack.c.bf16 %v233_v26, %v233_v26 }
 0x24d   :  { %420 = vmatmul.msk.bf16.vlgmr.msra.gmra.mxu3 %vm226_vm12, %v234_v27  ;;  %421 = vmatmul.msk.bf16.vlgmr.msrb.gmra.mxu1 %vm226_vm12, %v234_v27 }
 0x2ca   :  { %v308_v28 = vpop.f32.mrf.mxu1 }
 0x2cb   :  { %v314_v30 = vrot.slane %v308_v28, 7 }
 0x2d0   :  { %v295_v31 = vpop.f32.mrf.mxu3 }
 0x2d1   :  { %v316_v32 = vsel %vm315_vm13, %v295_v31, %v314_v30 }
 0x2d2   :  { %322 = vst.msk [vmem:[#allocation2] sm:$0x3] %vm320_vm14, %v316_v32  ;;  %v310_v33 = vpop.f32.mrf.mxu1 }
 0x2d3   :  { %335 = dma.vmem_to_hbm [thread:$0]  %s331_s27, 32, %s333_s30, [#allocation3]  }
 0x2d8   :  { %v297_v34 = vpop.f32.mrf.mxu3 }
 0x2d9   :  { %475 = dma.done.wait [#allocation3], 32  }
 0x2da   :  { %476 = vsyncadd [#allocation3], 4294967264 }
 0x2db   :  { %342 = vsyncpa [#allocation3], 1 }

</bundles_post_ra>
